<compile_context>
chip_gen: v7x
topology: tpu7x:2x2x1
jax: 0.10.0
libtpu: 0.0.40
codegen_flags: <defaults>
</compile_context>

<pallas_src>
import jax
import jax.numpy as jnp
from jax.experimental import pallas as pl
from jax.experimental.pallas import tpu as pltpu

_LANE = 128


def _round_up(x, m):
    return ((x + m - 1) // m) * m


def _conv1x1_kernel(x_ref, w_ref, b_ref, o_ref):
    # x_ref: (N_blk, C_in, T)  w_ref: (C_out, C_in)  b_ref: (C_out, 1)
    # o_ref: (N_blk, C_out, T)
    w = w_ref[...]
    b = b_ref[...].astype(jnp.float32)
    # N_blk is static and small -> unrolled loop of lane-dense 2D MXU matmuls.
    for n in range(x_ref.shape[0]):
        acc = jnp.dot(w, x_ref[n], preferred_element_type=jnp.float32)
        o_ref[n] = (acc + b).astype(o_ref.dtype)


def _choose_tiling(N, C_in, C_out, HW, itemsize):
    """Pick (n_blk, T, HW_pad): each grid step should move ~MB-scale HBM bytes
    while the double-buffered VMEM footprint stays far under v7x's budget."""
    # Sublane packing: f32 -> 8, bf16 -> 16, int8 -> 32.
    sub = 8 * max(1, 4 // max(1, itemsize))
    hbm_per_lane = (C_in + C_out) * itemsize                    # HBM bytes / batch row / lane
    # VMEM cost per lane per batch row: sublane-padded channels, x2 double-buffer.
    vmem_per_lane = 2 * (_round_up(C_in, sub) + _round_up(C_out, sub)) * itemsize
    vmem_budget = 16 << 20                                      # conservative vs v7x 32 MiB scoped

    total = N * _round_up(HW, _LANE) * hbm_per_lane
    if total <= (4 << 20):
        # Tiny problem: one (or a couple of) blocks is fastest; per-step
        # pipeline overhead would dominate sub-100 KiB DMAs.
        step_bytes = max(total, _LANE * hbm_per_lane)
    else:
        # ~2 MB per step, but keep >= ~8 steps so both v7x cores stay busy and
        # DMA of block i+1 hides behind compute/store of block i.
        step_bytes = min(2 << 20, max(total // 8, 512 << 10))
    # Never exceed what the VMEM budget allows (double-buffered, sublane-padded).
    step_bytes = min(step_bytes, (vmem_budget // vmem_per_lane) * hbm_per_lane)

    lanes_cap = max(_LANE, (step_bytes // hbm_per_lane) // _LANE * _LANE)

    if HW <= lanes_cap:
        # Whole (padded) spatial extent in one block; fold batch rows to fill it.
        T = _round_up(HW, _LANE)
        HW_pad = T
        max_nblk = min(N, max(1, lanes_cap // T), 64)           # cap unroll depth
        n_blk = 1
        for d in range(max_nblk, 0, -1):
            if N % d == 0:
                n_blk = d
                break
    else:
        # Spatial tiling: multiple of 128, >= 512 lanes, minimizing zero-pad of HW.
        floor = min(512, lanes_cap)
        best_t, best_pad = _LANE, None
        for t in range(lanes_cap, floor - 1, -_LANE):
            pad = (-HW) % t
            if best_pad is None or pad < best_pad:
                best_t, best_pad = t, pad
                if pad == 0:
                    break
        T = best_t
        HW_pad = _round_up(HW, T)
        n_blk = 1
    return n_blk, T, HW_pad


def conv1x1(x_nchw, weight, bias):
    """1x1 Conv2d forward matching nn.Conv2d(C_in, C_out, 1).

    x_nchw: (N, C_in, H, W); weight: (C_out, C_in, 1, 1); bias: (C_out,)
    returns (N, C_out, H, W)
    """
    N, C_in, H, W = x_nchw.shape
    C_out = weight.shape[0]
    HW = H * W
    itemsize = jnp.dtype(x_nchw.dtype).itemsize

    n_blk, T, HW_pad = _choose_tiling(N, C_in, C_out, HW, itemsize)

    # Free reshapes only — no transposes.
    x3d = x_nchw.reshape(N, C_in, HW)
    if HW_pad != HW:
        # Keep the lane dim a multiple of 128 -> unmasked stores, bounded tiles.
        x3d = jnp.pad(x3d, ((0, 0), (0, 0), (0, HW_pad - HW)))
    w2d = weight.reshape(C_out, C_in)
    b2d = bias.reshape(C_out, 1)

    grid = (N // n_blk, HW_pad // T)

    sub = 8 * max(1, 4 // max(1, itemsize))
    vmem_need = 2 * n_blk * (_round_up(C_in, sub) + _round_up(C_out, sub)) * T * itemsize
    vmem_limit = int(min(48 << 20, max(32 << 20, 2 * vmem_need)))

    out3d = pl.pallas_call(
        _conv1x1_kernel,
        out_shape=jax.ShapeDtypeStruct((N, C_out, HW_pad), x_nchw.dtype),
        grid=grid,
        in_specs=[
            # x: N_blk batch rows, full channels, one lane-dense spatial tile.
            pl.BlockSpec((n_blk, C_in, T), lambda nb, t: (nb, 0, t)),
            # Weight / bias: constant index maps -> DMA'd once, VMEM-resident.
            pl.BlockSpec((C_out, C_in), lambda nb, t: (0, 0)),
            pl.BlockSpec((C_out, 1), lambda nb, t: (0, 0)),
        ],
        out_specs=pl.BlockSpec((n_blk, C_out, T), lambda nb, t: (nb, 0, t)),
        compiler_params=pltpu.CompilerParams(
            # Independent output blocks on both axes -> megacore sharding on v7x.
            dimension_semantics=("parallel", "parallel"),
            vmem_limit_bytes=vmem_limit,
        ),
    )(x3d, w2d, b2d)

    if HW_pad != HW:
        out3d = out3d[:, :, :HW]
    return out3d.reshape(N, C_out, H, W)


if __name__ == "__main__":
    # Small shapes consistent with the module: batch=2, C_in=4, C_out=8, 16x16.
    N, C_in, C_out, H, W = 2, 4, 8, 16, 16

    key = jax.random.PRNGKey(0)
    kx, kw, kb = jax.random.split(key, 3)

    x = jax.random.normal(kx, (N, C_in, H, W), dtype=jnp.float32)
    # Deterministic synthetic parameters (shapes match nn.Conv2d(C_in, C_out, 1)).
    bound = 1.0 / jnp.sqrt(C_in * 1 * 1)
    weight = jax.random.uniform(kw, (C_out, C_in, 1, 1), jnp.float32, -bound, bound)
    bias = jax.random.uniform(kb, (C_out,), jnp.float32, -bound, bound)

    y = jax.block_until_ready(conv1x1(x, weight, bias))

    # Pure-JAX reference check (einsum over channels + bias).
    y_ref = (jnp.einsum("nchw,oc->nohw", x, weight.reshape(C_out, C_in))
             + bias[None, :, None, None])
    assert y.shape == (N, C_out, H, W)
    assert jnp.allclose(y, y_ref, atol=1e-5, rtol=1e-5)

    print("KERNEL_OK")
</pallas_src>

<mosaic_0001>
module attributes {stable_mosaic.version = 11 : i64} {
  func.func @_conv1x1_kernel(%arg0: i32, %arg1: i32, %arg2: memref<2x4x256xf32, #tpu.memory_space<vmem>>, %arg3: memref<8x4xf32, #tpu.memory_space<vmem>>, %arg4: memref<8x1xf32, #tpu.memory_space<vmem>>, %arg5: memref<2x8x256xf32, #tpu.memory_space<vmem>>) attributes {dimension_semantics = [#tpu.dimension_semantics<parallel>, #tpu.dimension_semantics<parallel>], iteration_bounds = array<i64: 1, 1>, scalar_prefetch = 0 : i64, scratch_operands = 0 : i64, tpu.core_type = #tpu.core_type<tc>, window_params = [{transform_indices = @transform_0, window_bounds = array<i64: 2, 4, 256>}, {pipeline_mode = #tpu.pipeline_mode<synchronous>, transform_indices = @transform_1, window_bounds = array<i64: 8, 4>}, {pipeline_mode = #tpu.pipeline_mode<synchronous>, transform_indices = @transform_2, window_bounds = array<i64: 8, 1>}, {transform_indices = @transform_3, window_bounds = array<i64: 2, 8, 256>}]} {
    %c0 = arith.constant 0 : index
    %c0_0 = arith.constant 0 : index
    %0 = vector.load %arg3[%c0, %c0_0] : memref<8x4xf32, #tpu.memory_space<vmem>>, vector<8x4xf32>
    %c0_1 = arith.constant 0 : index
    %c0_2 = arith.constant 0 : index
    %1 = vector.load %arg4[%c0_1, %c0_2] : memref<8x1xf32, #tpu.memory_space<vmem>>, vector<8x1xf32>
    %c0_3 = arith.constant 0 : index
    %c0_4 = arith.constant 0 : index
    %c0_5 = arith.constant 0 : index
    %2 = vector.load %arg2[%c0_3, %c0_4, %c0_5] : memref<2x4x256xf32, #tpu.memory_space<vmem>>, vector<1x4x256xf32>
    %3 = vector.shape_cast %2 : vector<1x4x256xf32> to vector<4x256xf32>
    %cst = arith.constant dense<0.000000e+00> : vector<8x256xf32>
    %4 = tpu.matmul %0, %3, %cst {dimension_numbers = #tpu.dot_dimension_numbers<[1], [0], [0], [1], [0, 0, 1, 1], [], []>} : vector<8x4xf32>, vector<4x256xf32>, vector<8x256xf32> -> vector<8x256xf32>
    %5 = vector.broadcast %1 : vector<8x1xf32> to vector<8x256xf32>
    %6 = arith.addf %4, %5 : vector<8x256xf32>
    %c0_6 = arith.constant 0 : index
    %c0_7 = arith.constant 0 : index
    %c0_8 = arith.constant 0 : index
    %7 = vector.load %arg5[%c0_6, %c0_7, %c0_8] : memref<2x8x256xf32, #tpu.memory_space<vmem>>, vector<1x8x256xf32>
    %8 = vector.shape_cast %7 : vector<1x8x256xf32> to vector<8x256xf32>
    %9 = vector.shape_cast %6 : vector<8x256xf32> to vector<1x8x256xf32>
    tpu.vector_store %arg5[%c0_6, %c0_7, %c0_8], %9 {strides = array<i32>} : memref<2x8x256xf32, #tpu.memory_space<vmem>>, vector<1x8x256xf32>,
    %c1 = arith.constant 1 : index
    %c0_9 = arith.constant 0 : index
    %c0_10 = arith.constant 0 : index
    %10 = vector.load %arg2[%c1, %c0_9, %c0_10] : memref<2x4x256xf32, #tpu.memory_space<vmem>>, vector<1x4x256xf32>
    %11 = vector.shape_cast %10 : vector<1x4x256xf32> to vector<4x256xf32>
    %cst_11 = arith.constant dense<0.000000e+00> : vector<8x256xf32>
    %12 = tpu.matmul %0, %11, %cst_11 {dimension_numbers = #tpu.dot_dimension_numbers<[1], [0], [0], [1], [0, 0, 1, 1], [], []>} : vector<8x4xf32>, vector<4x256xf32>, vector<8x256xf32> -> vector<8x256xf32>
    %13 = vector.broadcast %1 : vector<8x1xf32> to vector<8x256xf32>
    %14 = arith.addf %12, %13 : vector<8x256xf32>
    %c1_12 = arith.constant 1 : index
    %c0_13 = arith.constant 0 : index
    %c0_14 = arith.constant 0 : index
    %15 = vector.load %arg5[%c1_12, %c0_13, %c0_14] : memref<2x8x256xf32, #tpu.memory_space<vmem>>, vector<1x8x256xf32>
    %16 = vector.shape_cast %15 : vector<1x8x256xf32> to vector<8x256xf32>
    %17 = vector.shape_cast %14 : vector<8x256xf32> to vector<1x8x256xf32>
    tpu.vector_store %arg5[%c1_12, %c0_13, %c0_14], %17 {strides = array<i32>} : memref<2x8x256xf32, #tpu.memory_space<vmem>>, vector<1x8x256xf32>,
    return
  }
  func.func @transform_0(%arg0: i32, %arg1: i32) -> (i32, i32, i32) {
    %c0_i32 = arith.constant 0 : i32
    %c0_i32_0 = arith.constant 0 : i32
    return %arg0, %c0_i32, %arg1 : i32, i32, i32
  }
  func.func @transform_1(%arg0: i32, %arg1: i32) -> (i32, i32) {
    %c0_i32 = arith.constant 0 : i32
    %c0_i32_0 = arith.constant 0 : i32
    %c0_i32_1 = arith.constant 0 : i32
    return %c0_i32, %c0_i32_0 : i32, i32
  }
  func.func @transform_2(%arg0: i32, %arg1: i32) -> (i32, i32) {
    %c0_i32 = arith.constant 0 : i32
    %c0_i32_0 = arith.constant 0 : i32
    %c0_i32_1 = arith.constant 0 : i32
    return %c0_i32, %c0_i32_0 : i32, i32
  }
  func.func @transform_3(%arg0: i32, %arg1: i32) -> (i32, i32, i32) {
    %c0_i32 = arith.constant 0 : i32
    %c0_i32_0 = arith.constant 0 : i32
    return %arg0, %c0_i32, %arg1 : i32, i32, i32
  }
}

</mosaic_0001>

<bundles_post_ra>
// kernel: tpu_custom_call.1
= control target key start
LH: loop header
LB: loop body
LE: loop exit
PB: predicated region body
PF: predicated region fallthrough
CT: control target
= control target key end

     0   :  { %vm29_vm0 = vcmask 1043456   ;;  %v244_v4 = vmov 0.0   ;;  %s297_s0 = inlined_call_operand.vmem [shape: f32[2,4,256], index: 0, kind: input, shape index: {}]   ;;  %s298_s1 = inlined_call_operand.vmem [shape: f32[8,4], index: 1, kind: input, shape index: {}]   ;;  %s299_s2 = inlined_call_operand.vmem [shape: f32[8,1], index: 2, kind: input, shape index: {}]   ;;  %s300_s3 = inlined_call_operand.hbm [shape: f32[2,8,256], index: 3, kind: output, shape index: {}]  }
   0x1   :  { %v17_v0 = vld [vmem:[%s297_s0] sm:$0xff]  ;;  %v208_v1 = vld [vmem:[%s297_s0 + $0x8] sm:$0xff]  ;;  %98 = vmatprep.mubr.f32.mxu0 %v244_v4  ;;  %179 = vmatprep.mubr.f32.mxu1 %v244_v4 }
   0x2   :  { %v24_v2 = vcombine.high %v17_v0, %v17_v0  ;;  %v110_v3 = vcombine.high %v208_v1, %v208_v1 }
   0x3   :  { %8 = vsyncpa [#allocation3], 0  ;;  %v15_v5 = vld [vmem:[%s298_s1] sm:$0xff]  ;;  %vm25_vm1 = vcmask 31744   ;;  %v245_v6 = vmov 0   ;;  %s246_s0 = smov [#allocation2]  }
   0x4   :  { %217 = vset.pattern.permute.xlu0 %v245_v6  ;;  %205 = vmatprep.subr.msk.mxu0 %vm29_vm0, %v24_v2  ;;  %v16_v7 = vld [vmem:[%s299_s2] sm:$0xff]  ;;  %s194_s1 = sshll.u32 %s246_s0, 4  ;;  %s195_s1 = int_to_ptr.vmem [resolvable:$true] %s194_s1 }
   0x5   :  { %209 = vmatprep.subr.msk.mxu1 %vm29_vm0, %v110_v3  ;;  %206 = vmatpush1.msk.msra.mxu0 %vm29_vm0, %v17_v0  ;;  %s220_s2 = scalar_lea.vmem %s195_s1, 512  ;;  %p225_p1 = scmp.lt.s32.totalorder %s195_s1, %s195_s1 }
   0x6   :  { %210 = vmatpush1.msk.msra.mxu1 %vm29_vm0, %v208_v1  ;;  %207 = vmatmul.mubr.msk.f32.vlgmr.msra.gmra.mrb[0].mxu0 %vm25_vm1, %v15_v5  ;;  %p221_p0 = scmp.ne.s32.totalorder %s195_s1, %s220_s2  ;;  %p226_p2 = scmp.lt.s32.totalorder %s220_s2, %s220_s2 }
   0x7   :  { %211 = vmatmul.mubr.msk.f32.vlgmr.msra.gmra.mrb[0].mxu1 %vm25_vm1, %v15_v5  ;;  %20 = vperm.xlu0 %217, %v16_v7  }
   0x8   :  { %p227_p3 = por %p226_p2, %p225_p1 }
   0xa   :  { %p228_p4 = pnand %p227_p3, %p221_p0 }
  0x86   :  { %v21_v8 = vpop.permute.xlu0 %20 }
  0xd9   :  { %v100_v9 = vpop.f32.mrb[0].mxu0 }
  0xda   :  { %v181_v10 = vpop.f32.mrb[0].mxu1  ;;  %v101_v11 = vadd.f32 %v100_v9, %v21_v8  ;;  %v102_v13 = vpop.f32.mrb[1].mxu0 }
  0xdb   :  { %v182_v12 = vadd.f32 %v181_v10, %v21_v8  ;;  %v183_v14 = vpop.f32.mrb[1].mxu1  ;;  %v103_v15 = vadd.f32 %v102_v13, %v21_v8 }
  0xdc   :  { %v184_v16 = vadd.f32 %v183_v14, %v21_v8  ;;  %105 = vst [vmem:[#allocation2] sm:$0xff] %v101_v11 }
  0xdd   :  { %187 = vst [vmem:[#allocation2 + $0x10] sm:$0xff] %v182_v12  ;;  %106 = vst [vmem:[#allocation2 + $0x8] sm:$0xff] %v103_v15 }
  0xde   :  { %188 = vst [vmem:[#allocation2 + $0x18] sm:$0xff] %v184_v16 }
  0xdf   :  { %231 = shalt.err (!%p228_p4)
}
  0xe0   :  { %s232_s22 = scalar_lea.hbm %s300_s3, 512 }
  0xe1   :  { %p233_p5 = scmp.ne.s32.totalorder %s300_s3, %s232_s22  ;;  %p236_p6 = scmp.lt.u32.totalorder %s232_s22, %s300_s3 }
  0xe3   :  { %p238_p7 = pnand %p236_p6, %p233_p5 }
  0xe5   :  { %241 = shalt.err (!%p238_p7)
}
  0xe6   :  { %s247_s27 = smov 256   ;;  %s248_s28 = smov 16  }
  0xe7   :  { %200 = dma.vmem_to_hbm [thread:$0]  %s195_s1, 512, %s300_s3, [#allocation3], %s247_s27, %s247_s27, %s248_s28  }
  0xe8   :  { %242 = dma.done.wait [#allocation3], 512  }
  0xe9   :  { %243 = vsyncadd [#allocation3], 4294966784 }
  0xea   :  { %204 = vsyncpa [#allocation3], 1 }

</bundles_post_ra>
